<compile_context>
chip_gen: v7x
topology: tpu7x:2x2x1
jax: 0.10.0
libtpu: 0.0.40
codegen_flags: <defaults>
</compile_context>

<pallas_src>
import functools
import math

import jax
import jax.numpy as jnp
import numpy as np
from jax import lax
from jax.experimental import pallas as pl
from jax.experimental.pallas import tpu as pltpu

LANE = 128
SUBLANE = 8
M_TARGET = 512           # stacked rows per grid step (amortizes step overhead)


def _round_up(x, m):
    return (x + m - 1) // m * m


def _tensorcores_per_device():
    """Heuristic: v7x (and v4/v5p megacore) expose 2 TensorCores per device."""
    try:
        kind = jax.devices()[0].device_kind.lower()
    except Exception:
        return 1
    return 2 if any(t in kind for t in ("7", "v4", "v5p")) else 1


def _conv_toeplitz(w_hwio, W):
    """Per-kh band matrices: B[kh, wi*Cin+ci, wo*Cout+co] = w[kh, wi-wo+pad, ci, co]."""
    K, _, Cin, Cout = w_hwio.shape
    pad = K // 2
    B = np.zeros((K, W * Cin, W * Cout), dtype=np.float32)
    for wo in range(W):
        for kw in range(K):
            wi = wo + kw - pad
            if 0 <= wi < W:
                B[:, wi * Cin:(wi + 1) * Cin, wo * Cout:(wo + 1) * Cout] = w_hwio[:, kw]
    return B


def _resblock_kernel(xc_ref, w1_ref, b1_ref, w2_ref, ws_ref, b2_ref, mask_ref,
                     out_ref, *, K2, R1, R2, LCIN, KH_S, R0):
    xc = xc_ref[0]                                   # (R1, K1*W*Cin_p) f32

    # ---- conv1: one deep-contraction matmul (im2col was done in the wrapper) ----
    acc1 = jnp.dot(xc, w1_ref[...], preferred_element_type=jnp.float32)
    # bias + ReLU, then zero halo rows (realizes conv2's SAME zero padding exactly)
    h1 = jnp.maximum(acc1 + b1_ref[...], 0.0) * mask_ref[...]

    # ---- conv2 + 1x1 shortcut: accumulating per-kh band dots (no lane concats) ----
    # shortcut operand x[PR : PR+R2] lives inside the conv1 im2col operand
    xs = xc[R0:R0 + R2, KH_S * LCIN:(KH_S + 1) * LCIN]
    acc2 = jnp.dot(xs, ws_ref[...], preferred_element_type=jnp.float32) + b2_ref[...]
    for kh in range(K2):                              # static unroll
        acc2 += jnp.dot(h1[kh:kh + R2, :], w2_ref[kh],
                        preferred_element_type=jnp.float32)

    out_ref[0] = jnp.maximum(acc2, 0.0)               # full-block lane-dense store


def make_residual_block_forward(w1, b1, w2, b2, ws, *, batch, height, width):
    """One-time (init-time) prep; returns a jitted forward(x_nchw) -> (N,C2,H,W)."""
    w1 = np.asarray(w1, np.float32); b1 = np.asarray(b1, np.float32)
    w2 = np.asarray(w2, np.float32); b2 = np.asarray(b2, np.float32)
    ws = np.asarray(ws, np.float32)

    N, H, W = batch, height, width
    K1, _, Cin, C1 = w1.shape
    K2, _, _, C2 = w2.shape
    P1, P2 = K1 // 2, K2 // 2
    PR = P1 + P2

    # pad channel counts so each fused (width, channel) lane axis is a 128 multiple
    cg = LANE // math.gcd(W, LANE)
    Cin_p, C1_p, C2_p = (_round_up(c, cg) for c in (Cin, C1, C2))
    LCIN, LC1, LC2 = W * Cin_p, W * C1_p, W * C2_p

    # per-sample row stride (sublane aligned); >= PR zero rows separate samples
    Hs = _round_up(H + 2 * PR, SUBLANE)

    # samples per grid step: fill the MXU M dimension, but on 2-TensorCore
    # devices (v7x) keep >= 2 "parallel" grid steps so both cores are used
    tc = _tensorcores_per_device()
    nb_cap = max(1, M_TARGET // Hs)
    if tc > 1 and N >= tc:
        nb_cap = min(nb_cap, -(-N // tc))
    NB = max(1, min(N, nb_cap))
    nblk = -(-N // NB)
    Npad = nblk * NB

    R2 = NB * Hs                                   # conv2 / output rows per block
    R1 = R2 + _round_up(K2 - 1, SUBLANE)           # conv1 rows (incl. halo)
    Rpad = R1 + K1 - 1                             # padded input rows per block

    # shortcut slice location inside the conv1 im2col operand:
    #   xcat[:, r, kh-block] = x[r + kh]  =>  x[PR + r] = xcat[:, r + R0, KH_S-block]
    KH_S = min(PR, K1 - 1)
    R0 = PR - KH_S
    assert R0 + R2 <= R1

    # ---- host-side weight prep (runs ONCE, at module init) ----
    w1p = np.zeros((K1, K1, Cin_p, C1_p), np.float32); w1p[:, :, :Cin, :C1] = w1
    w2p = np.zeros((K2, K2, C1_p, C2_p), np.float32); w2p[:, :, :C1, :C2] = w2
    wsp = np.zeros((1, 1, Cin_p, C2_p), np.float32); wsp[:, :, :Cin, :C2] = ws

    W1f = jnp.asarray(_conv_toeplitz(w1p, W).reshape(K1 * LCIN, LC1))  # conv1 deep
    W2b = jnp.asarray(_conv_toeplitz(w2p, W))                          # (K2, LC1, LC2)
    Wsb = jnp.asarray(_conv_toeplitz(wsp, W)[0])                       # (LCIN, LC2)

    b1p = np.zeros((C1_p,), np.float32); b1p[:C1] = b1
    b2p = np.zeros((C2_p,), np.float32); b2p[:C2] = b2
    b1t = jnp.asarray(np.tile(b1p, W).reshape(1, LC1))
    b2t = jnp.asarray(np.tile(b2p, W).reshape(1, LC2))

    # 0/1 row mask: 1 on conv1-output rows that correspond to real image rows
    rr = np.arange(R1)
    mask = jnp.asarray((((rr % Hs) >= P2) & ((rr % Hs) < P2 + H)
                        & (rr < NB * Hs)).astype(np.float32).reshape(R1, 1))

    kernel = functools.partial(_resblock_kernel, K2=K2, R1=R1, R2=R2,
                               LCIN=LCIN, KH_S=KH_S, R0=R0)

    resblock = pl.pallas_call(
        kernel,
        out_shape=jax.ShapeDtypeStruct((nblk, R2, LC2), jnp.float32),
        grid_spec=pltpu.PrefetchScalarGridSpec(
            num_scalar_prefetch=0,
            grid=(nblk,),
            in_specs=[
                pl.BlockSpec((1, R1, K1 * LCIN), lambda b: (b, 0, 0)),
                pl.BlockSpec((K1 * LCIN, LC1), lambda b: (0, 0)),
                pl.BlockSpec((1, LC1), lambda b: (0, 0)),
                pl.BlockSpec((K2, LC1, LC2), lambda b: (0, 0, 0)),
                pl.BlockSpec((LCIN, LC2), lambda b: (0, 0)),
                pl.BlockSpec((1, LC2), lambda b: (0, 0)),
                pl.BlockSpec((R1, 1), lambda b: (0, 0)),
            ],
            out_specs=pl.BlockSpec((1, R2, LC2), lambda b: (b, 0, 0)),
        ),
        compiler_params=pltpu.CompilerParams(
            dimension_semantics=("parallel",)),
    )

    @jax.jit
    def forward(x_nchw):
        assert x_nchw.shape == (N, Cin, H, W)
        # layout glue: NCHW -> row-stacked, channel-padded, lane-flattened
        xh = jnp.transpose(x_nchw, (0, 2, 3, 1))                     # NHWC
        xh = jnp.pad(xh, ((0, Npad - N), (PR, Hs - H - PR),
                          (0, 0), (0, Cin_p - Cin)))
        xf = xh.reshape(nblk, NB * Hs, LCIN)
        xf = jnp.pad(xf, ((0, 0), (0, Rpad - NB * Hs), (0, 0)))
        # conv1 row-shift im2col done here (XLA), keeping the kernel concat-free
        xcat = jnp.concatenate([xf[:, kh:kh + R1, :] for kh in range(K1)], axis=2)

        out_flat = resblock(xcat, W1f, b1t, W2b, Wsb, b2t, mask)

        # strip batch / row / channel padding, back to NCHW
        out = out_flat.reshape(Npad, Hs, W, C2_p)[:N, :H, :, :C2]
        return jnp.transpose(out, (0, 3, 1, 2))

    return forward


def _ref_forward(x_nchw, w1, b1, w2, b2, ws):
    dn = ("NHWC", "HWIO", "NHWC")
    x = jnp.transpose(x_nchw, (0, 2, 3, 1))
    h = lax.conv_general_dilated(x, w1, (1, 1), "SAME", dimension_numbers=dn,
                                 precision=lax.Precision.HIGHEST) + b1
    h = jnp.maximum(h, 0.0)
    h = lax.conv_general_dilated(h, w2, (1, 1), "SAME", dimension_numbers=dn,
                                 precision=lax.Precision.HIGHEST) + b2
    sc = lax.conv_general_dilated(x, ws, (1, 1), "SAME", dimension_numbers=dn,
                                  precision=lax.Precision.HIGHEST)
    return jnp.transpose(jnp.maximum(h + sc, 0.0), (0, 3, 1, 2))


if __name__ == "__main__":
    # Module config: in_channels=4, channels=[8, 6], kernel_sizes=[3, 3]
    # (shortcut is a 1x1 conv without bias since in_channels != channels[-1]).
    # TODO(synk): Dropout2d / BatchNorm2d branches are not instantiated in this
    # config (dropout=0.0, batchnorm=False), so they are not implemented.
    N, Cin, H, W = 2, 4, 16, 16
    C1, C2 = 8, 6
    K1, K2 = 3, 3

    key = jax.random.PRNGKey(0)
    k_x, k_w1, k_b1, k_w2, k_b2, k_ws = jax.random.split(key, 6)
    x = jax.random.normal(k_x, (N, Cin, H, W), jnp.float32)
    w1 = jax.random.normal(k_w1, (K1, K1, Cin, C1), jnp.float32) * 0.1
    b1 = jax.random.normal(k_b1, (C1,), jnp.float32) * 0.1
    w2 = jax.random.normal(k_w2, (K2, K2, C1, C2), jnp.float32) * 0.1
    b2 = jax.random.normal(k_b2, (C2,), jnp.float32) * 0.1
    ws = jax.random.normal(k_ws, (1, 1, Cin, C2), jnp.float32) * 0.1  # shortcut

    # one-time init (host-side Toeplitz/bias/mask prep + jit of the forward)
    forward = make_residual_block_forward(w1, b1, w2, b2, ws,
                                          batch=N, height=H, width=W)

    out = jax.block_until_ready(forward(x))
    ref = jax.block_until_ready(_ref_forward(x, w1, b1, w2, b2, ws))

    assert out.shape == (N, C2, H, W)
    np.testing.assert_allclose(np.asarray(out), np.asarray(ref),
                               rtol=1e-3, atol=1e-3)
    print("KERNEL_OK")
</pallas_src>

<mosaic_0001>
module attributes {stable_mosaic.version = 11 : i64} {
  func.func @_resblock_kernel(%arg0: i32, %arg1: memref<1x56x384xf32, #tpu.memory_space<vmem>>, %arg2: memref<384x128xf32, #tpu.memory_space<vmem>>, %arg3: memref<1x128xf32, #tpu.memory_space<vmem>>, %arg4: memref<3x128x128xf32, #tpu.memory_space<vmem>>, %arg5: memref<128x128xf32, #tpu.memory_space<vmem>>, %arg6: memref<1x128xf32, #tpu.memory_space<vmem>>, %arg7: memref<56x1xf32, #tpu.memory_space<vmem>>, %arg8: memref<1x48x128xf32, #tpu.memory_space<vmem>>) attributes {dimension_semantics = [#tpu.dimension_semantics<parallel>], iteration_bounds = array<i64: 1>, scalar_prefetch = 0 : i64, scratch_operands = 0 : i64, tpu.core_type = #tpu.core_type<tc>, window_params = [{transform_indices = @transform_0, window_bounds = array<i64: 1, 56, 384>}, {pipeline_mode = #tpu.pipeline_mode<synchronous>, transform_indices = @transform_1, window_bounds = array<i64: 384, 128>}, {pipeline_mode = #tpu.pipeline_mode<synchronous>, transform_indices = @transform_2, window_bounds = array<i64: 1, 128>}, {pipeline_mode = #tpu.pipeline_mode<synchronous>, transform_indices = @transform_3, window_bounds = array<i64: 3, 128, 128>}, {pipeline_mode = #tpu.pipeline_mode<synchronous>, transform_indices = @transform_4, window_bounds = array<i64: 128, 128>}, {pipeline_mode = #tpu.pipeline_mode<synchronous>, transform_indices = @transform_5, window_bounds = array<i64: 1, 128>}, {pipeline_mode = #tpu.pipeline_mode<synchronous>, transform_indices = @transform_6, window_bounds = array<i64: 56, 1>}, {transform_indices = @transform_7, window_bounds = array<i64: 1, 48, 128>}]} {
    %c0 = arith.constant 0 : index
    %c0_0 = arith.constant 0 : index
    %c0_1 = arith.constant 0 : index
    %0 = vector.load %arg1[%c0, %c0_0, %c0_1] : memref<1x56x384xf32, #tpu.memory_space<vmem>>, vector<1x56x384xf32>
    %1 = vector.shape_cast %0 : vector<1x56x384xf32> to vector<56x384xf32>
    %c0_2 = arith.constant 0 : index
    %c0_3 = arith.constant 0 : index
    %2 = vector.load %arg2[%c0_2, %c0_3] : memref<384x128xf32, #tpu.memory_space<vmem>>, vector<384x128xf32>
    %cst = arith.constant dense<0.000000e+00> : vector<56x128xf32>
    %3 = tpu.matmul %1, %2, %cst {dimension_numbers = #tpu.dot_dimension_numbers<[1], [0], [0], [1], [0, 0, 1, 1], [], []>} : vector<56x384xf32>, vector<384x128xf32>, vector<56x128xf32> -> vector<56x128xf32>
    %c0_4 = arith.constant 0 : index
    %c0_5 = arith.constant 0 : index
    %4 = vector.load %arg3[%c0_4, %c0_5] : memref<1x128xf32, #tpu.memory_space<vmem>>, vector<1x128xf32>
    %5 = vector.broadcast %4 : vector<1x128xf32> to vector<56x128xf32>
    %6 = arith.addf %3, %5 : vector<56x128xf32>
    %cst_6 = arith.constant 0.000000e+00 : f32
    %7 = vector.broadcast %cst_6 : f32 to vector<56x128xf32>
    %8 = arith.maximumf %6, %7 : vector<56x128xf32>
    %c0_7 = arith.constant 0 : index
    %c0_8 = arith.constant 0 : index
    %9 = vector.load %arg7[%c0_7, %c0_8] : memref<56x1xf32, #tpu.memory_space<vmem>>, vector<56x1xf32>
    %10 = vector.broadcast %9 : vector<56x1xf32> to vector<56x128xf32>
    %11 = arith.mulf %8, %10 : vector<56x128xf32>
    %12 = vector.extract_strided_slice %1 {offsets = [0, 256], sizes = [48, 128], strides = [1, 1]} : vector<56x384xf32> to vector<48x128xf32>
    %c0_9 = arith.constant 0 : index
    %c0_10 = arith.constant 0 : index
    %13 = vector.load %arg5[%c0_9, %c0_10] : memref<128x128xf32, #tpu.memory_space<vmem>>, vector<128x128xf32>
    %cst_11 = arith.constant dense<0.000000e+00> : vector<48x128xf32>
    %14 = tpu.matmul %12, %13, %cst_11 {dimension_numbers = #tpu.dot_dimension_numbers<[1], [0], [0], [1], [0, 0, 1, 1], [], []>} : vector<48x128xf32>, vector<128x128xf32>, vector<48x128xf32> -> vector<48x128xf32>
    %c0_12 = arith.constant 0 : index
    %c0_13 = arith.constant 0 : index
    %15 = vector.load %arg6[%c0_12, %c0_13] : memref<1x128xf32, #tpu.memory_space<vmem>>, vector<1x128xf32>
    %16 = vector.broadcast %15 : vector<1x128xf32> to vector<48x128xf32>
    %17 = arith.addf %14, %16 : vector<48x128xf32>
    %18 = vector.extract_strided_slice %11 {offsets = [0, 0], sizes = [48, 128], strides = [1, 1]} : vector<56x128xf32> to vector<48x128xf32>
    %c0_14 = arith.constant 0 : index
    %c0_15 = arith.constant 0 : index
    %c0_16 = arith.constant 0 : index
    %19 = vector.load %arg4[%c0_14, %c0_15, %c0_16] : memref<3x128x128xf32, #tpu.memory_space<vmem>>, vector<1x128x128xf32>
    %20 = vector.shape_cast %19 : vector<1x128x128xf32> to vector<128x128xf32>
    %cst_17 = arith.constant dense<0.000000e+00> : vector<48x128xf32>
    %21 = tpu.matmul %18, %20, %cst_17 {dimension_numbers = #tpu.dot_dimension_numbers<[1], [0], [0], [1], [0, 0, 1, 1], [], []>} : vector<48x128xf32>, vector<128x128xf32>, vector<48x128xf32> -> vector<48x128xf32>
    %22 = arith.addf %17, %21 : vector<48x128xf32>
    %23 = vector.extract_strided_slice %11 {offsets = [1, 0], sizes = [48, 128], strides = [1, 1]} : vector<56x128xf32> to vector<48x128xf32>
    %c1 = arith.constant 1 : index
    %c0_18 = arith.constant 0 : index
    %c0_19 = arith.constant 0 : index
    %24 = vector.load %arg4[%c1, %c0_18, %c0_19] : memref<3x128x128xf32, #tpu.memory_space<vmem>>, vector<1x128x128xf32>
    %25 = vector.shape_cast %24 : vector<1x128x128xf32> to vector<128x128xf32>
    %cst_20 = arith.constant dense<0.000000e+00> : vector<48x128xf32>
    %26 = tpu.matmul %23, %25, %cst_20 {dimension_numbers = #tpu.dot_dimension_numbers<[1], [0], [0], [1], [0, 0, 1, 1], [], []>} : vector<48x128xf32>, vector<128x128xf32>, vector<48x128xf32> -> vector<48x128xf32>
    %27 = arith.addf %22, %26 : vector<48x128xf32>
    %28 = vector.extract_strided_slice %11 {offsets = [2, 0], sizes = [48, 128], strides = [1, 1]} : vector<56x128xf32> to vector<48x128xf32>
    %c2 = arith.constant 2 : index
    %c0_21 = arith.constant 0 : index
    %c0_22 = arith.constant 0 : index
    %29 = vector.load %arg4[%c2, %c0_21, %c0_22] : memref<3x128x128xf32, #tpu.memory_space<vmem>>, vector<1x128x128xf32>
    %30 = vector.shape_cast %29 : vector<1x128x128xf32> to vector<128x128xf32>
    %cst_23 = arith.constant dense<0.000000e+00> : vector<48x128xf32>
    %31 = tpu.matmul %28, %30, %cst_23 {dimension_numbers = #tpu.dot_dimension_numbers<[1], [0], [0], [1], [0, 0, 1, 1], [], []>} : vector<48x128xf32>, vector<128x128xf32>, vector<48x128xf32> -> vector<48x128xf32>
    %32 = arith.addf %27, %31 : vector<48x128xf32>
    %cst_24 = arith.constant 0.000000e+00 : f32
    %33 = vector.broadcast %cst_24 : f32 to vector<48x128xf32>
    %34 = arith.maximumf %32, %33 : vector<48x128xf32>
    %c0_25 = arith.constant 0 : index
    %c0_26 = arith.constant 0 : index
    %c0_27 = arith.constant 0 : index
    %35 = vector.load %arg8[%c0_25, %c0_26, %c0_27] : memref<1x48x128xf32, #tpu.memory_space<vmem>>, vector<1x48x128xf32>
    %36 = vector.shape_cast %35 : vector<1x48x128xf32> to vector<48x128xf32>
    %37 = vector.shape_cast %34 : vector<48x128xf32> to vector<1x48x128xf32>
    tpu.vector_store %arg8[%c0_25, %c0_26, %c0_27], %37 {strides = array<i32>} : memref<1x48x128xf32, #tpu.memory_space<vmem>>, vector<1x48x128xf32>,
    return
  }
  func.func @transform_0(%arg0: i32) -> (i32, i32, i32) {
    %c0_i32 = arith.constant 0 : i32
    %c0_i32_0 = arith.constant 0 : i32
    %c0_i32_1 = arith.constant 0 : i32
    return %arg0, %c0_i32, %c0_i32_0 : i32, i32, i32
  }
  func.func @transform_1(%arg0: i32) -> (i32, i32) {
    %c0_i32 = arith.constant 0 : i32
    %c0_i32_0 = arith.constant 0 : i32
    %c0_i32_1 = arith.constant 0 : i32
    return %c0_i32, %c0_i32_0 : i32, i32
  }
  func.func @transform_2(%arg0: i32) -> (i32, i32) {
    %c0_i32 = arith.constant 0 : i32
    %c0_i32_0 = arith.constant 0 : i32
    %c0_i32_1 = arith.constant 0 : i32
    return %c0_i32, %c0_i32_0 : i32, i32
  }
  func.func @transform_3(%arg0: i32) -> (i32, i32, i32) {
    %c0_i32 = arith.constant 0 : i32
    %c0_i32_0 = arith.constant 0 : i32
    %c0_i32_1 = arith.constant 0 : i32
    %c0_i32_2 = arith.constant 0 : i32
    return %c0_i32, %c0_i32_0, %c0_i32_1 : i32, i32, i32
  }
  func.func @transform_4(%arg0: i32) -> (i32, i32) {
    %c0_i32 = arith.constant 0 : i32
    %c0_i32_0 = arith.constant 0 : i32
    %c0_i32_1 = arith.constant 0 : i32
    return %c0_i32, %c0_i32_0 : i32, i32
  }
  func.func @transform_5(%arg0: i32) -> (i32, i32) {
    %c0_i32 = arith.constant 0 : i32
    %c0_i32_0 = arith.constant 0 : i32
    %c0_i32_1 = arith.constant 0 : i32
    return %c0_i32, %c0_i32_0 : i32, i32
  }
  func.func @transform_6(%arg0: i32) -> (i32, i32) {
    %c0_i32 = arith.constant 0 : i32
    %c0_i32_0 = arith.constant 0 : i32
    %c0_i32_1 = arith.constant 0 : i32
    return %c0_i32, %c0_i32_0 : i32, i32
  }
  func.func @transform_7(%arg0: i32) -> (i32, i32, i32) {
    %c0_i32 = arith.constant 0 : i32
    %c0_i32_0 = arith.constant 0 : i32
    %c0_i32_1 = arith.constant 0 : i32
    return %arg0, %c0_i32, %c0_i32_0 : i32, i32, i32
  }
}

</mosaic_0001>

<bundles_post_ra>
// kernel: forward.1
= control target key start
LH: loop header
LB: loop body
LE: loop exit
PB: predicated region body
PF: predicated region fallthrough
CT: control target
= control target key end

     0   :  { %v1521_v3 = vmov 0   ;;  %v1522_v60 = vmov 0.0|0.0   ;;  %vm1523_vm0 = vmmov 0   ;;  %vm617_vm1 = vcmask 1046528   ;;  %s2090_s1 = inlined_call_operand.vmem [shape: f32[384,128], index: 1, kind: input, shape index: {}]   ;;  %s2091_s0 = inlined_call_operand.vmem [shape: f32[1,56,384], index: 0, kind: input, shape index: {}]   ;;  %s2092_s6 = inlined_call_operand.vmem [shape: f32[56,1], index: 6, kind: input, shape index: {}]   ;;  %s2093_s3 = inlined_call_operand.vmem [shape: f32[3,128,128], index: 3, kind: input, shape index: {}]   ;;  %s2094_s4 = inlined_call_operand.vmem [shape: f32[128,128], index: 4, kind: input, shape index: {}]   ;;  %s2095_s2 = inlined_call_operand.vmem [shape: f32[1,128], index: 2, kind: input, shape index: {}]   ;;  %s2096_s5 = inlined_call_operand.vmem [shape: f32[1,128], index: 5, kind: input, shape index: {}]   ;;  %s2097_s7 = inlined_call_operand.vmem [shape: f32[1,48,128], index: 7, kind: output, shape index: {}]  }
   0x1   :  { %v63_v0 = vld [vmem:[%s2090_s1 + $0x80] sm:$0xff]  ;;  %v64_v1 = vld [vmem:[%s2090_s1 + $0x88] sm:$0xff]  ;;  %1519 = vset.pattern.permute.xlu0 %v1521_v3  ;;  %1520 = vset.pattern.permute.xlu1 %v1521_v3  ;;  %v65_v6 = vld [vmem:[%s2090_s1 + $0x90] sm:$0xff]  ;;  %vm755_vm2 = vcmask 1045504  }
   0x2   :  { %v47_v2 = vld [vmem:[%s2090_s1] sm:$0xff]  ;;  %v1307_v4 = vpack.c.bf16 %v64_v1, %v63_v0  ;;  %v48_v5 = vld [vmem:[%s2090_s1 + $0x8] sm:$0xff]  ;;  %v66_v7 = vld [vmem:[%s2090_s1 + $0x98] sm:$0xff] }
   0x3   :  { %v1309_v8 = vpack.c.bf16 %v48_v5, %v47_v2  ;;  %v1311_v9 = vpack.c.bf16 %v66_v7, %v65_v6  ;;  %v49_v10 = vld [vmem:[%s2090_s1 + $0x10] sm:$0xff]  ;;  %v50_v11 = vld [vmem:[%s2090_s1 + $0x18] sm:$0xff]  ;;  %v67_v12 = vld [vmem:[%s2090_s1 + $0xa0] sm:$0xff] }
   0x4   :  { %1308 = vmatprep.subr.bf16.mxu1 %v1307_v4  ;;  %v68_v13 = vld [vmem:[%s2090_s1 + $0xa8] sm:$0xff]  ;;  %v1313_v14 = vpack.c.bf16 %v50_v11, %v49_v10  ;;  %v51_v16 = vld [vmem:[%s2090_s1 + $0x20] sm:$0xff]  ;;  %v69_v18 = vld [vmem:[%s2090_s1 + $0xb0] sm:$0xff] }
   0x5   :  { %1310 = vmatpush3.bf16.msra.mxu1 %v1309_v8  ;;  %v1315_v15 = vpack.c.bf16 %v68_v13, %v67_v12  ;;  %v52_v17 = vld [vmem:[%s2090_s1 + $0x28] sm:$0xff]  ;;  %v70_v19 = vld [vmem:[%s2090_s1 + $0xb8] sm:$0xff]  ;;  %v53_v22 = vld [vmem:[%s2090_s1 + $0x30] sm:$0xff] }
   0x6   :  { %1312 = vmatprep.subr.bf16.mxu1 %v1311_v9  ;;  %v1317_v20 = vpack.c.bf16 %v52_v17, %v51_v16  ;;  %v1319_v21 = vpack.c.bf16 %v70_v19, %v69_v18  ;;  %v54_v23 = vld [vmem:[%s2090_s1 + $0x38] sm:$0xff]  ;;  %v71_v24 = vld [vmem:[%s2090_s1 + $0xc0] sm:$0xff]  ;;  %v72_v25 = vld [vmem:[%s2090_s1 + $0xc8] sm:$0xff] }
   0x7   :  { %v27_v26 = vld [vmem:[%s2091_s0 + $0x8] sm:$0xff]  ;;  %v1321_v27 = vpack.c.bf16 %v54_v23, %v53_v22  ;;  %v1323_v28 = vpack.c.bf16 %v72_v25, %v71_v24  ;;  %v55_v29 = vld [vmem:[%s2090_s1 + $0x40] sm:$0xff]  ;;  %v73_v31 = vld [vmem:[%s2090_s1 + $0xd0] sm:$0xff] }
   0x8   :  { %166 = vmatprep.mubr.f32.mxu1 %v27_v26  ;;  %v56_v30 = vld [vmem:[%s2090_s1 + $0x48] sm:$0xff]  ;;  %v74_v32 = vld [vmem:[%s2090_s1 + $0xd8] sm:$0xff]  ;;  %v57_v35 = vld [vmem:[%s2090_s1 + $0x50] sm:$0xff] }
   0x9   :  { %1314 = vmatpush3.bf16.msra.mxu1 %v1313_v14  ;;  %v1325_v33 = vpack.c.bf16 %v56_v30, %v55_v29  ;;  %v1327_v34 = vpack.c.bf16 %v74_v32, %v73_v31  ;;  %v58_v36 = vld [vmem:[%s2090_s1 + $0x58] sm:$0xff]  ;;  %v75_v37 = vld [vmem:[%s2090_s1 + $0xe0] sm:$0xff]  ;;  %v76_v38 = vld [vmem:[%s2090_s1 + $0xe8] sm:$0xff]  ;;  %v1524_v31 = vmov 0.0  }
   0xa   :  { %1316 = vmatprep.subr.bf16.mxu1 %v1315_v15  ;;  %v1329_v39 = vpack.c.bf16 %v58_v36, %v57_v35  ;;  %v1331_v40 = vpack.c.bf16 %v76_v38, %v75_v37  ;;  %v59_v41 = vld [vmem:[%s2090_s1 + $0x60] sm:$0xff]  ;;  %v60_v42 = vld [vmem:[%s2090_s1 + $0x68] sm:$0xff]  ;;  %v77_v43 = vld [vmem:[%s2090_s1 + $0xf0] sm:$0xff] }
   0xb   :  { %v78_v44 = vld [vmem:[%s2090_s1 + $0xf8] sm:$0xff]  ;;  %v309_v45 = vld [vmem:[%s2092_s6] sm:$0xff]  ;;  %v1333_v46 = vpack.c.bf16 %v60_v42, %v59_v41  ;;  %v311_v47 = vld [vmem:[%s2092_s6 + $0x10] sm:$0xff] }
   0xc   :  { %318 = vperm.xlu0 %1519, %v309_v45   ;;  %v1335_v48 = vpack.c.bf16 %v78_v44, %v77_v43  ;;  %v61_v49 = vld [vmem:[%s2090_s1 + $0x70] sm:$0xff]  ;;  %v62_v50 = vld [vmem:[%s2090_s1 + $0x78] sm:$0xff]  ;;  %v310_v51 = vld [vmem:[%s2092_s6 + $0x8] sm:$0xff]  ;;  %328 = vperm.xlu1 %1520, %v311_v47  }
   0xd   :  { %1318 = vmatpush3.bf16.msra.mxu1 %v1317_v20  ;;  %v312_v52 = vld [vmem:[%s2092_s6 + $0x18] sm:$0xff]  ;;  %v1337_v53 = vpack.c.bf16 %v62_v50, %v61_v49  ;;  %v79_v54 = vld [vmem:[%s2090_s1 + $0x100] sm:$0xff]  ;;  %v80_v55 = vld [vmem:[%s2090_s1 + $0x108] sm:$0xff] }
   0xe   :  { %1320 = vmatprep.subr.bf16.mxu1 %v1319_v21  ;;  %v313_v56 = vld [vmem:[%s2092_s6 + $0x20] sm:$0xff]  ;;  %v314_v57 = vld [vmem:[%s2092_s6 + $0x28] sm:$0xff]  ;;  %v1340_v59 = vpack.c.bf16 %v80_v55, %v79_v54  ;;  %v81_v61 = vld [vmem:[%s2090_s1 + $0x110] sm:$0xff] }
   0xf   :  { %v26_v58 = vld [vmem:[%s2091_s0] sm:$0xff]  ;;  %v82_v62 = vld [vmem:[%s2090_s1 + $0x118] sm:$0xff]  ;;  %v315_v0 = vld [vmem:[%s2092_s6 + $0x30] sm:$0xff] }
  0x10   :  { %323 = vperm.xlu0 %1519, %v310_v51   ;;  %333 = vperm.xlu1 %1520, %v312_v52   ;;  %v30_v63 = vld [vmem:[%s2091_s0 + $0x20] sm:$0xff]  ;;  %v1343_v1 = vpack.c.bf16 %v82_v62, %v81_v61  ;;  %v29_v2 = vld [vmem:[%s2091_s0 + $0x18] sm:$0xff]  ;;  %v84_v4 = vld [vmem:[%s2090_s1 + $0x128] sm:$0xff] }
  0x11   :  { %1322 = vmatpush3.bf16.msra.mxu1 %v1321_v27  ;;  %v83_v3 = vld [vmem:[%s2090_s1 + $0x120] sm:$0xff]  ;;  %v33_v5 = vld [vmem:[%s2091_s0 + $0x38] sm:$0xff]  ;;  %v32_v7 = vld [vmem:[%s2091_s0 + $0x30] sm:$0xff] }
  0x12   :  { %1324 = vmatprep.subr.bf16.mxu1 %v1323_v28  ;;  %v1346_v6 = vpack.c.bf16 %v84_v4, %v83_v3  ;;  %v85_v8 = vld [vmem:[%s2090_s1 + $0x130] sm:$0xff]  ;;  %v86_v9 = vld [vmem:[%s2090_s1 + $0x138] sm:$0xff]  ;;  %v35_v12 = vld [vmem:[%s2091_s0 + $0x48] sm:$0xff] }
  0x13   :  { %v36_v10 = vld [vmem:[%s2091_s0 + $0x50] sm:$0xff]  ;;  %v1349_v11 = vpack.c.bf16 %v86_v9, %v85_v8  ;;  %v87_v13 = vld [vmem:[%s2090_s1 + $0x140] sm:$0xff]  ;;  %v88_v14 = vld [vmem:[%s2090_s1 + $0x148] sm:$0xff] }
  0x14   :  { %338 = vperm.xlu0 %1519, %v313_v56   ;;  %343 = vperm.xlu1 %1520, %v314_v57   ;;  %v39_v15 = vld [vmem:[%s2091_s0 + $0x68] sm:$0xff]  ;;  %v1352_v16 = vpack.c.bf16 %v88_v14, %v87_v13  ;;  %v38_v17 = vld [vmem:[%s2091_s0 + $0x60] sm:$0xff]  ;;  %v89_v18 = vld [vmem:[%s2090_s1 + $0x150] sm:$0xff] }
  0x15   :  { %1326 = vmatpush3.bf16.msra.mxu1 %v1325_v33  ;;  %v90_v19 = vld [vmem:[%s2090_s1 + $0x158] sm:$0xff]  ;;  %v42_v20 = vld [vmem:[%s2091_s0 + $0x80] sm:$0xff]  ;;  %v92_v24 = vld [vmem:[%s2090_s1 + $0x168] sm:$0xff] }
  0x16   :  { %1328 = vmatprep.subr.bf16.mxu1 %v1327_v34  ;;  %v1355_v21 = vpack.c.bf16 %v90_v19, %v89_v18  ;;  %v41_v22 = vld [vmem:[%s2091_s0 + $0x78] sm:$0xff]  ;;  %v91_v23 = vld [vmem:[%s2090_s1 + $0x160] sm:$0xff]  ;;  %v44_v27 = vld [vmem:[%s2091_s0 + $0x90] sm:$0xff] }
  0x17   :  { %v45_v25 = vld [vmem:[%s2091_s0 + $0x98] sm:$0xff]  ;;  %v1358_v26 = vpack.c.bf16 %v92_v24, %v91_v23  ;;  %v93_v28 = vld [vmem:[%s2090_s1 + $0x170] sm:$0xff]  ;;  %v1788_v33 = vld [vmem:[%s2091_s0 + $0x28] sm:$0xff] }
  0x18   :  { %348 = vperm.xlu0 %1519, %v315_v0   ;;  %v94_v29 = vld [vmem:[%s2090_s1 + $0x178] sm:$0xff]  ;;  %v28_v32 = vld [vmem:[%s2091_s0 + $0x10] sm:$0xff]  ;;  %v1795_v34 = vld [vmem:[%s2091_s0 + $0x40] sm:$0xff] }
  0x19   :  { %1330 = vmatpush3.bf16.msra.mxu1 %v1329_v39  ;;  %v1361_v30 = vpack.c.bf16 %v94_v29, %v93_v28  ;;  %v1802_v35 = vld [vmem:[%s2091_s0 + $0x58] sm:$0xff]  ;;  %v1809_v36 = vld [vmem:[%s2091_s0 + $0x70] sm:$0xff]  ;;  %v1816_v37 = vld [vmem:[%s2091_s0 + $0x88] sm:$0xff] }
  0x1a   :  { %1332 = vmatprep.subr.bf16.mxu1 %v1331_v40  ;;  %v46_v38 = vld [vmem:[%s2091_s0 + $0xa0] sm:$0xff]  ;;  %v477_v40 = vld [vmem:[%s2093_s3 + $0x8] sm:$0xff]  ;;  %v478_v42 = vld [vmem:[%s2093_s3 + $0x10] sm:$0xff] }
  0x1b   :  { %v476_v39 = vld [vmem:[%s2093_s3] sm:$0xff]  ;;  %v479_v43 = vld [vmem:[%s2093_s3 + $0x18] sm:$0xff]  ;;  %v485_v52 = vld [vmem:[%s2093_s3 + $0x48] sm:$0xff] }
  0x1c   :  { %v1395_v41 = vpack.c.bf16 %v477_v40, %v476_v39  ;;  %v1399_v44 = vpack.c.bf16 %v479_v43, %v478_v42  ;;  %v480_v45 = vld [vmem:[%s2093_s3 + $0x20] sm:$0xff]  ;;  %v483_v49 = vld [vmem:[%s2093_s3 + $0x38] sm:$0xff]  ;;  %v486_v54 = vld [vmem:[%s2093_s3 + $0x50] sm:$0xff] }
  0x1d   :  { %1334 = vmatpush3.bf16.msra.mxu1 %v1333_v46  ;;  %v481_v46 = vld [vmem:[%s2093_s3 + $0x28] sm:$0xff]  ;;  %v484_v51 = vld [vmem:[%s2093_s3 + $0x40] sm:$0xff]  ;;  %v487_v55 = vld [vmem:[%s2093_s3 + $0x58] sm:$0xff] }
  0x1e   :  { %1336 = vmatprep.subr.bf16.mxu1 %v1335_v48  ;;  %1396 = vmatprep.subr.bf16.mxu0 %v1395_v41  ;;  %v1403_v47 = vpack.c.bf16 %v481_v46, %v480_v45  ;;  %v482_v48 = vld [vmem:[%s2093_s3 + $0x30] sm:$0xff]  ;;  %v1415_v56 = vpack.c.bf16 %v487_v55, %v486_v54  ;;  %v488_v57 = vld [vmem:[%s2093_s3 + $0x60] sm:$0xff]  ;;  %v491_v61 = vld [vmem:[%s2093_s3 + $0x78] sm:$0xff] }
  0x1f   :  { %1398 = vmatpush3.bf16.msra.mxu0 %v1395_v41  ;;  %v1407_v50 = vpack.c.bf16 %v483_v49, %v482_v48  ;;  %v895_v0 = vld [vmem:[%s2093_s3 + $0x88] sm:$0xff]  ;;  %v362_v8 = vld [vmem:[%s2094_s4 + $0x20] sm:$0xff]  ;;  %v369_v18 = vld [vmem:[%s2094_s4 + $0x58] sm:$0xff] }
  0x20   :  { %1400 = vmatprep.subr.bf16.mxu0 %v1399_v44  ;;  %v359_v3 = vld [vmem:[%s2094_s4 + $0x8] sm:$0xff]  ;;  %v366_v14 = vld [vmem:[%s2094_s4 + $0x40] sm:$0xff]  ;;  %v372_v23 = vld [vmem:[%s2094_s4 + $0x70] sm:$0xff] }
  0x21   :  { %1338 = vmatpush3.bf16.msra.mxu1 %v1337_v53  ;;  %v1411_v53 = vpack.c.bf16 %v485_v52, %v484_v51  ;;  %v363_v9 = vld [vmem:[%s2094_s4 + $0x28] sm:$0xff]  ;;  %v373_v24 = vld [vmem:[%s2094_s4 + $0x78] sm:$0xff] }
  0x22   :  { %1339 = vmatprep.subr.bf16.mxu1 %v1522_v60 }
  0x23   :  { %1402 = vmatpush3.bf16.msra.mxu0 %v1399_v44 }
  0x24   :  { %167 = vmatmul.mubr.f32.vlgmr.msra.gmra.mrb[0].mxu1 %v26_v58  ;;  %1404 = vmatprep.subr.bf16.mxu0 %v1403_v47  ;;  %v489_v58 = vld [vmem:[%s2093_s3 + $0x68] sm:$0xff] }
  0x25   :  { %1341 = vmatpush3.bf16.msra.mxu1 %v1340_v59  ;;  %171 = vmatprep.mubr.f32.mxu1 %v30_v63  ;;  %v1419_v59 = vpack.c.bf16 %v489_v58, %v488_v57  ;;  %v894_v63 = vld [vmem:[%s2093_s3 + $0x80] sm:$0xff] }
  0x26   :  { %1342 = vmatprep.subr.bf16.mxu1 %v1522_v60 }
  0x27   :  { %1406 = vmatpush3.bf16.msra.mxu0 %v1403_v47  ;;  %v1940_v47 = vld [vmem:[%s2095_s2] ss:$0 sm:$0xff] }
  0x28   :  { %172 = vmatmul.mubr.f32.gmra.mrb[2].mxu1 %v29_v2  ;;  %1408 = vmatprep.subr.bf16.mxu0 %v1407_v50  ;;  %v358_v2 = vld [vmem:[%s2094_s4] sm:$0xff] }
  0x29   :  { %1344 = vmatpush3.bf16.msra.mxu1 %v1343_v1  ;;  %176 = vmatprep.mubr.f32.mxu1 %v33_v5  ;;  %v1877_v1 = vpack.c.bf16 %v895_v0, %v894_v63  ;;  %v1363_v4 = vpack.c.bf16 %v359_v3, %v358_v2  ;;  %v360_v5 = vld [vmem:[%s2094_s4 + $0x10] sm:$0xff] }
  0x2a   :  { %1345 = vmatprep.subr.bf16.mxu1 %v1522_v60 }
  0x2b   :  { %1410 = vmatpush3.bf16.msra.mxu0 %v1407_v50 }
  0x2c   :  { %177 = vmatmul.mubr.f32.gmra.mrb[4].mxu1 %v32_v7  ;;  %1412 = vmatprep.subr.bf16.mxu0 %v1411_v53 }
  0x2d   :  { %1347 = vmatpush3.bf16.msra.mxu1 %v1346_v6  ;;  %181 = vmatprep.mubr.f32.mxu1 %v36_v10  ;;  %v361_v6 = vld [vmem:[%s2094_s4 + $0x18] sm:$0xff]  ;;  %v1371_v10 = vpack.c.bf16 %v363_v9, %v362_v8  ;;  %v899_v8 = vld [vmem:[%s2093_s3 + $0xa8] sm:$0xff] }
  0x2e   :  { %1348 = vmatprep.subr.bf16.mxu1 %v1522_v60  ;;  %v1367_v7 = vpack.c.bf16 %v361_v6, %v360_v5 }
  0x2f   :  { %1414 = vmatpush3.bf16.msra.mxu0 %v1411_v53 }
  0x30   :  { %182 = vmatmul.mubr.f32.gmra.mrb[6].mxu1 %v35_v12  ;;  %1416 = vmatprep.subr.bf16.mxu0 %v1415_v56  ;;  %v365_v12 = vld [vmem:[%s2094_s4 + $0x38] sm:$0xff] }
  0x31   :  { %1350 = vmatpush3.bf16.msra.mxu1 %v1349_v11  ;;  %186 = vmatprep.mubr.f32.mxu1 %v39_v15  ;;  %v364_v11 = vld [vmem:[%s2094_s4 + $0x30] sm:$0xff]  ;;  %v367_v15 = vld [vmem:[%s2094_s4 + $0x48] sm:$0xff] }
  0x32   :  { %1351 = vmatprep.subr.bf16.mxu1 %v1522_v60  ;;  %v1375_v13 = vpack.c.bf16 %v365_v12, %v364_v11 }
  0x33   :  { %1418 = vmatpush3.bf16.msra.mxu0 %v1415_v56 }
  0x34   :  { %187 = vmatmul.mubr.f32.gmra.mrb[8].mxu1 %v38_v17  ;;  %1420 = vmatprep.subr.bf16.mxu0 %v1419_v59  ;;  %v368_v17 = vld [vmem:[%s2094_s4 + $0x50] sm:$0xff] }
  0x35   :  { %1353 = vmatpush3.bf16.msra.mxu1 %v1352_v16  ;;  %191 = vmatprep.mubr.f32.mxu1 %v42_v20  ;;  %v1379_v16 = vpack.c.bf16 %v367_v15, %v366_v14  ;;  %v1383_v19 = vpack.c.bf16 %v369_v18, %v368_v17  ;;  %v370_v20 = vld [vmem:[%s2094_s4 + $0x60] sm:$0xff] }
  0x36   :  { %1354 = vmatprep.subr.bf16.mxu1 %v1522_v60 }
  0x37   :  { %1422 = vmatpush3.bf16.msra.mxu0 %v1419_v59  ;;  %v896_v59 = vld [vmem:[%s2093_s3 + $0x90] sm:$0xff] }
  0x38   :  { %192 = vmatmul.mubr.f32.gmra.mrb[10].mxu1 %v41_v22 }
  0x39   :  { %1356 = vmatpush3.bf16.msra.mxu1 %v1355_v21  ;;  %196 = vmatprep.mubr.f32.mxu1 %v45_v25  ;;  %v371_v21 = vld [vmem:[%s2094_s4 + $0x68] sm:$0xff]  ;;  %v1391_v25 = vpack.c.bf16 %v373_v24, %v372_v23 }
  0x3a   :  { %1357 = vmatprep.subr.bf16.mxu1 %v1522_v60  ;;  %v1387_v22 = vpack.c.bf16 %v371_v21, %v370_v20  ;;  %v900_v20 = vld [vmem:[%s2093_s3 + $0xb0] sm:$0xff]  ;;  %v901_v21 = vld [vmem:[%s2093_s3 + $0xb8] sm:$0xff] }
  0x3c   :  { %197 = vmatmul.mubr.f32.gmra.mrb[12].mxu1 %v44_v27 }
  0x3d   :  { %1359 = vmatpush3.bf16.msra.mxu1 %v1358_v26  ;;  %1122 = vmatprep.mubr.msk.f32.mxu1 %vm1523_vm0, %v1524_v31 }
  0x3e   :  { %1360 = vmatprep.subr.bf16.mxu1 %v1522_v60  ;;  %v490_v60 = vld [vmem:[%s2093_s3 + $0x70] sm:$0xff] }
  0x3f   :  { %v1423_v62 = vpack.c.bf16 %v491_v61, %v490_v60  ;;  %v897_v60 = vld [vmem:[%s2093_s3 + $0x98] sm:$0xff] }
  0x40   :  { %v1431_v6 = vpack.c.bf16 %v897_v60, %v896_v59 }
  0x41   :  { %1362 = vmatpush3.bf16.msra.mxu1 %v1361_v30  ;;  %1424 = vmatprep.subr.bf16.mxu0 %v1423_v62 }
  0x42   :  { %1426 = vmatpush3.bf16.msra.mxu0 %v1423_v62  ;;  %1364 = vmatprep.subr.bf16.mxu1 %v1363_v4 }
  0x43   :  { %1428 = vmatprep.subr.bf16.mxu0 %v1877_v1 }
  0x44   :  { %1123 = vmatmul.mubr.f32.vlgmr.msra.gmra.mrb[14].mxu1 %v28_v32 }
  0x45   :  { %1125 = vmatprep.mubr.msk.f32.mxu1 %vm1523_vm0, %v1524_v31  ;;  %1366 = vmatpush3.bf16.msra.mxu1 %v1363_v4 }
  0x46   :  { %1368 = vmatprep.subr.bf16.mxu1 %v1367_v7 }
  0x48   :  { %1126 = vmatmul.mubr.f32.gmra.mrb[16].mxu1 %v1788_v33 }
  0x49   :  { %1128 = vmatprep.mubr.msk.f32.mxu1 %vm1523_vm0, %v1524_v31  ;;  %1370 = vmatpush3.bf16.msra.mxu1 %v1367_v7  ;;  %v898_v7 = vld [vmem:[%s2093_s3 + $0xa0] sm:$0xff] }
  0x4a   :  { %1372 = vmatprep.subr.bf16.mxu1 %v1371_v10 }
  0x4c   :  { %1129 = vmatmul.mubr.f32.gmra.mrb[18].mxu1 %v1795_v34 }
  0x4d   :  { %1131 = vmatprep.mubr.msk.f32.mxu1 %vm1523_vm0, %v1524_v31  ;;  %1374 = vmatpush3.bf16.msra.mxu1 %v1371_v10 }
  0x4e   :  { %1376 = vmatprep.subr.bf16.mxu1 %v1375_v13 }
  0x50   :  { %1132 = vmatmul.mubr.f32.gmra.mrb[20].mxu1 %v1802_v35 }
  0x51   :  { %1134 = vmatprep.mubr.msk.f32.mxu1 %vm1523_vm0, %v1524_v31  ;;  %1378 = vmatpush3.bf16.msra.mxu1 %v1375_v13 }
  0x52   :  { %1380 = vmatprep.subr.bf16.mxu1 %v1379_v16 }
  0x54   :  { %1135 = vmatmul.mubr.f32.gmra.mrb[22].mxu1 %v1809_v36 }
  0x55   :  { %1137 = vmatprep.mubr.msk.f32.mxu1 %vm1523_vm0, %v1524_v31  ;;  %1382 = vmatpush3.bf16.msra.mxu1 %v1379_v16  ;;  %v1435_v16 = vpack.c.bf16 %v899_v8, %v898_v7 }
  0x56   :  { %1384 = vmatprep.subr.bf16.mxu1 %v1383_v19 }
  0x58   :  { %1138 = vmatmul.mubr.f32.gmra.mrb[24].mxu1 %v1816_v37 }
  0x59   :  { %1140 = vmatprep.mubr.msk.f32.mxu1 %vm1523_vm0, %v1524_v31  ;;  %1386 = vmatpush3.bf16.msra.mxu1 %v1383_v19 }
  0x5a   :  { %1388 = vmatprep.subr.bf16.mxu1 %v1387_v22 }
  0x5c   :  { %1141 = vmatmul.mubr.f32.gmra.mrb[26].mxu1 %v46_v38 }
  0x5d   :  { %1175 = vmatprep.mubr.f32.mxu1 %v28_v32  ;;  %1390 = vmatpush3.bf16.msra.mxu1 %v1387_v22 }
  0x5e   :  { %1392 = vmatprep.subr.bf16.mxu1 %v1391_v25 }
  0x61   :  { %1394 = vmatpush3.bf16.msra.mxu1 %v1391_v25 }
  0x64   :  { %1176 = vmatmul.mubr.f32.vlgmr.msra.gmra.mrb[28].mxu1 %v1788_v33 }
  0x65   :  { %1178 = vmatprep.mubr.f32.mxu1 %v1795_v34 }
  0x68   :  { %1179 = vmatmul.mubr.f32.gmra.mrb[30].mxu1 %v1802_v35 }
  0x69   :  { %1181 = vmatprep.mubr.f32.mxu1 %v1809_v36 }
  0x6c   :  { %1182 = vmatmul.mubr.f32.gmra.mrb[32].mxu1 %v1816_v37 }
  0x8b   :  { %v319_v50 = vpop.permute.xlu0 %318  ;;  %v329_v2 = vpop.permute.xlu1 %328 }
  0x8f   :  { %v324_v61 = vpop.permute.xlu0 %323 }
  0xf7   :  { %v958_v26 = vpop.f32.mrb[0].mxu1 }
  0xf8   :  { %v959_v27 = vpop.f32.mrb[1].mxu1 }
  0xf9   :  { %v960_v28 = vadd.f32 %v959_v27, %v958_v26 }
  0xfb   :  { %v961_v29 = vpop.f32.mrb[2].mxu1  ;;  %v169_v48 = vadd.f32 %v960_v28, %v1940_v47 }
  0xfc   :  { %v962_v30 = vpop.f32.mrb[3].mxu1 }
  0xfd   :  { %v963_v31 = vadd.f32 %v962_v30, %v961_v29  ;;  %v1439_v29 = vpack.c.bf16 %v901_v21, %v900_v20  ;;  %v912_v20 = vld [vmem:[%s2093_s3 + $0x110] sm:$0xff]  ;;  %v913_v21 = vld [vmem:[%s2093_s3 + $0x118] sm:$0xff] }
  0xff   :  { %v964_v32 = vpop.f32.mrb[4].mxu1  ;;  %v174_v54 = vadd.f32 %v963_v31, %v1940_v47 }
 0x100   :  { %v965_v38 = vpop.f32.mrb[5].mxu1 }
 0x101   :  { %v966_v39 = vadd.f32 %v965_v38, %v964_v32  ;;  %v902_v38 = vld [vmem:[%s2093_s3 + $0xc0] sm:$0xff] }
 0x103   :  { %v967_v40 = vpop.f32.mrb[6].mxu1  ;;  %v179_v63 = vadd.f32 %v966_v39, %v1940_v47  ;;  %v903_v39 = vld [vmem:[%s2093_s3 + $0xc8] sm:$0xff] }
 0x104   :  { %v968_v41 = vpop.f32.mrb[7].mxu1 }
 0x105   :  { %v969_v33 = vadd.f32 %v968_v41, %v967_v40 }
 0x107   :  { %v970_v42 = vpop.f32.mrb[8].mxu1  ;;  %v184_v9 = vadd.f32 %v969_v33, %v1940_v47 }
 0x108   :  { %v971_v34 = vpop.f32.mrb[9].mxu1 }
 0x109   :  { %v972_v43 = vadd.f32 %v971_v34, %v970_v42 }
 0x10b   :  { %v973_v35 = vpop.f32.mrb[10].mxu1  ;;  %v189_v27 = vadd.f32 %v972_v43, %v1940_v47 }
 0x10c   :  { %v974_v44 = vpop.f32.mrb[11].mxu1 }
 0x10d   :  { %v1933_v36 = vadd.f32 %v974_v44, %v973_v35  ;;  %v339_v35 = vpop.permute.xlu0 %338 }
 0x10f   :  { %v976_v37 = vpop.f32.mrb[12].mxu1  ;;  %v194_v43 = vadd.f32 %v1933_v36, %v1940_v47 }
 0x110   :  { %v977_v45 = vpop.f32.mrb[13].mxu1 }
 0x111   :  { %v1935_v46 = vadd.f32 %v977_v45, %v976_v37  ;;  %v1443_v37 = vpack.c.bf16 %v903_v39, %v902_v38  ;;  %v921_v38 = vld [vmem:[%s2093_s3 + $0x158] sm:$0xff] }
 0x117   :  { %v268_v49 = vpop.f32.mrb[14].mxu1 }
 0x118   :  { %v269_v51 = vadd.f32 %v268_v49, %v169_v48  ;;  %v1124_v52 = vpop.f32.mrb[15].mxu1 }
 0x11a   :  { %v302_v53 = vmax.f32 %v269_v51, 0.0  ;;  %v905_v51 = vld [vmem:[%s2093_s3 + $0xd8] sm:$0xff] }
 0x11b   :  { %v273_v55 = vpop.f32.mrb[16].mxu1 }
 0x11c   :  { %v351_v56 = vmul.f32 %v319_v50, %v302_v53  ;;  %v274_v57 = vadd.f32 %v273_v55, %v174_v54  ;;  %v1127_v58 = vpop.f32.mrb[17].mxu1  ;;  %v904_v50 = vld [vmem:[%s2093_s3 + $0xd0] sm:$0xff]  ;;  %v199_v55 = vadd.f32 %v1935_v46, %v1940_v47  ;;  %v907_v46 = vld [vmem:[%s2093_s3 + $0xe8] sm:$0xff] }
 0x11d   :  { %v1447_v59 = vpack.c.bf16 %v905_v51, %v904_v50  ;;  %v893_v50 = vld [vmem:[%s2096_s5] ss:$0 sm:$0xff] }
 0x11e   :  { %v303_v62 = vmax.f32 %v274_v57, 0.0  ;;  %1216 = vmatprep.mubr.f32.mxu0 %v351_v56  ;;  %v618_v10 = vrot.slane %v351_v56, 1  ;;  %v756_v13 = vrot.slane %v351_v56, 2 }
 0x11f   :  { %v278_v0 = vpop.f32.mrb[18].mxu1 }
 0x120   :  { %v352_v3 = vmul.f32 %v324_v61, %v303_v62  ;;  %v279_v4 = vadd.f32 %v278_v0, %v179_v63  ;;  %v1130_v5 = vpop.f32.mrb[19].mxu1 }
 0x121   :  { %v349_v5 = vpop.permute.xlu0 %348 }
 0x122   :  { %v304_v11 = vmax.f32 %v279_v4, 0.0  ;;  %1217 = vmatmul.mubr.f32.vlgmr.msra.gmra.mrb[0].mxu0 %v352_v3  ;;  %v619_v12 = vrot.slane %v352_v3, 1  ;;  %v757_v14 = vrot.slane %v352_v3, 2 }
 0x123   :  { %1430 = vmatpush3.bf16.msra.mxu0 %v1877_v1  ;;  %v283_v15 = vpop.f32.mrb[20].mxu1  ;;  %v334_v1 = vpop.permute.xlu1 %333 }
 0x124   :  { %v353_v17 = vmul.f32 %v329_v2, %v304_v11  ;;  %v284_v18 = vadd.f32 %v283_v15, %v184_v9  ;;  %1432 = vmatprep.subr.bf16.mxu0 %v1431_v6  ;;  %v1133_v19 = vpop.f32.mrb[21].mxu1  ;;  %v620_v22 = vsel %vm617_vm1, %v618_v10, %v619_v12  ;;  %v1967_v23 = vsel %vm755_vm2, %v756_v13, %v757_v14  ;;  %v906_v2 = vld [vmem:[%s2093_s3 + $0xe0] sm:$0xff]  ;;  %v908_v10 = vld [vmem:[%s2093_s3 + $0xf0] sm:$0xff]  ;;  %v909_v11 = vld [vmem:[%s2093_s3 + $0xf8] sm:$0xff] }
 0x125   :  { %v1451_v7 = vpack.c.bf16 %v907_v46, %v906_v2 }
 0x126   :  { %v621_v24 = vrot.slane %v353_v17, 1  ;;  %v759_v25 = vrot.slane %v353_v17, 2  ;;  %v305_v26 = vmax.f32 %v284_v18, 0.0  ;;  %1219 = vmatprep.mubr.f32.mxu0 %v353_v17  ;;  %v910_v17 = vld [vmem:[%s2093_s3 + $0x100] sm:$0xff]  ;;  %v911_v18 = vld [vmem:[%s2093_s3 + $0x108] sm:$0xff] }
 0x127   :  { %1434 = vmatpush3.bf16.msra.mxu0 %v1431_v6  ;;  %v288_v28 = vpop.f32.mrb[22].mxu1  ;;  %v344_v53 = vpop.permute.xlu1 %343  ;;  %v1459_v19 = vpack.c.bf16 %v911_v18, %v910_v17 }
 0x128   :  { %v354_v30 = vmul.f32 %v334_v1, %v305_v26  ;;  %v289_v31 = vadd.f32 %v288_v28, %v189_v27  ;;  %1436 = vmatprep.subr.bf16.mxu0 %v1435_v16  ;;  %v1136_v32 = vpop.f32.mrb[23].mxu1  ;;  %v1977_v40 = vsel %vm617_vm1, %v619_v12, %v621_v24  ;;  %v1980_v41 = vsel %vm755_vm2, %v757_v14, %v759_v25  ;;  %v914_v1 = vld [vmem:[%s2093_s3 + $0x120] sm:$0xff]  ;;  %v916_v26 = vld [vmem:[%s2093_s3 + $0x130] sm:$0xff]  ;;  %v917_v27 = vld [vmem:[%s2093_s3 + $0x138] sm:$0xff] }
 0x129   :  { %v1455_v14 = vpack.c.bf16 %v909_v11, %v908_v10  ;;  %v1471_v28 = vpack.c.bf16 %v917_v27, %v916_v26  ;;  %v920_v32 = vld [vmem:[%s2093_s3 + $0x150] sm:$0xff] }
 0x12a   :  { %v623_v33 = vrot.slane %v354_v30, 1  ;;  %v761_v42 = vrot.slane %v354_v30, 2  ;;  %v306_v34 = vmax.f32 %v289_v31, 0.0  ;;  %1220 = vmatmul.mubr.f32.gmra.mrb[2].mxu0 %v354_v30  ;;  %v919_v30 = vld [vmem:[%s2093_s3 + $0x148] sm:$0xff]  ;;  %v1479_v39 = vpack.c.bf16 %v921_v38, %v920_v32 }
 0x12b   :  { %1438 = vmatpush3.bf16.msra.mxu0 %v1435_v16  ;;  %v293_v44 = vpop.f32.mrb[24].mxu1 }
 0x12c   :  { %v355_v45 = vmul.f32 %v339_v35, %v306_v34  ;;  %v294_v48 = vadd.f32 %v293_v44, %v194_v43  ;;  %1440 = vmatprep.subr.bf16.mxu0 %v1439_v29  ;;  %v1139_v49 = vpop.f32.mrb[25].mxu1  ;;  %v624_v52 = vsel %vm617_vm1, %v621_v24, %v623_v33  ;;  %v1992_v36 = vsel %vm755_vm2, %v759_v25, %v761_v42  ;;  %v915_v24 = vld [vmem:[%s2093_s3 + $0x128] sm:$0xff]  ;;  %v925_v34 = vld [vmem:[%s2093_s3 + $0x178] sm:$0xff] }
 0x12d   :  { %v1467_v25 = vpack.c.bf16 %v915_v24, %v914_v1 }
 0x12e   :  { %v307_v54 = vmax.f32 %v294_v48, 0.0  ;;  %1222 = vmatprep.mubr.f32.mxu0 %v355_v45  ;;  %v625_v56 = vrot.slane %v355_v45, 1  ;;  %v763_v57 = vrot.slane %v355_v45, 2 }
 0x12f   :  { %1442 = vmatpush3.bf16.msra.mxu0 %v1439_v29  ;;  %v298_v58 = vpop.f32.mrb[26].mxu1  ;;  %v918_v29 = vld [vmem:[%s2093_s3 + $0x140] sm:$0xff] }
 0x130   :  { %v356_v60 = vmul.f32 %v344_v53, %v307_v54  ;;  %v299_v61 = vadd.f32 %v298_v58, %v199_v55  ;;  %1444 = vmatprep.subr.bf16.mxu0 %v1443_v37  ;;  %v626_v62 = vsel %vm617_vm1, %v623_v33, %v625_v56  ;;  %v1142_v63 = vpop.f32.mrb[27].mxu1  ;;  %v1998_v0 = vsel %vm755_vm2, %v761_v42, %v763_v57  ;;  %v924_v42 = vld [vmem:[%s2093_s3 + $0x170] sm:$0xff] }
 0x131   :  { %v1475_v31 = vpack.c.bf16 %v919_v30, %v918_v29  ;;  %v1487_v43 = vpack.c.bf16 %v925_v34, %v924_v42 }
 0x132   :  { %v627_v47 = vrot.slane %v356_v60, 1  ;;  %v765_v3 = vrot.slane %v356_v60, 2  ;;  %v308_v4 = vmax.f32 %v299_v61, 0.0  ;;  %1223 = vmatmul.mubr.f32.gmra.mrb[4].mxu0 %v356_v60 }
 0x133   :  { %1446 = vmatpush3.bf16.msra.mxu0 %v1443_v37  ;;  %1257 = vmatprep.mubr.f32.mxu0 %v620_v22  ;;  %v1463_v22 = vpack.c.bf16 %v913_v21, %v912_v20 }
 0x134   :  { %v357_v6 = vmul.f32 %v349_v5, %v308_v4  ;;  %1448 = vmatprep.subr.bf16.mxu0 %v1447_v59  ;;  %v628_v8 = vsel %vm617_vm1, %v625_v56, %v627_v47  ;;  %v766_v9 = vsel %vm755_vm2, %v763_v57, %v765_v3 }
 0x136   :  { %v629_v12 = vrot.slane %v357_v6, 1  ;;  %v767_v13 = vrot.slane %v357_v6, 2 }
 0x137   :  { %1450 = vmatpush3.bf16.msra.mxu0 %v1447_v59  ;;  %v1177_v35 = vpop.f32.mrb[28].mxu1 }
 0x138   :  { %1452 = vmatprep.subr.bf16.mxu0 %v1451_v7  ;;  %v630_v15 = vsel %vm617_vm1, %v627_v47, %v629_v12  ;;  %v768_v16 = vsel %vm755_vm2, %v765_v3, %v767_v13  ;;  %v447_v44 = vpop.f32.mrb[29].mxu1  ;;  %v453_v51 = vadd.f32 %v1177_v35, %v893_v50 }
 0x13b   :  { %1454 = vmatpush3.bf16.msra.mxu0 %v1451_v7  ;;  %v1180_v37 = vpop.f32.mrb[30].mxu1 }
 0x13c   :  { %1456 = vmatprep.subr.bf16.mxu0 %v1455_v14  ;;  %v457_v45 = vpop.f32.mrb[31].mxu1  ;;  %v463_v54 = vadd.f32 %v1180_v37, %v893_v50 }
 0x13d   :  { %v458_v56 = vadd.f32 %v893_v50, %v457_v45 }
 0x13f   :  { %1458 = vmatpush3.bf16.msra.mxu0 %v1455_v14  ;;  %v1183_v48 = vpop.f32.mrb[32].mxu1 }
 0x140   :  { %1460 = vmatprep.subr.bf16.mxu0 %v1459_v19  ;;  %v467_v49 = vpop.f32.mrb[33].mxu1  ;;  %v473_v61 = vadd.f32 %v1183_v48, %v893_v50 }
 0x142   :  { %1258 = vmatmul.mubr.f32.vlgmr.msra.gmra.mrb[0].mxu0 %v1977_v40  ;;  %v922_v40 = vld [vmem:[%s2093_s3 + $0x160] sm:$0xff] }
 0x143   :  { %1260 = vmatprep.mubr.f32.mxu0 %v624_v52  ;;  %1462 = vmatpush3.bf16.msra.mxu0 %v1459_v19  ;;  %v448_v52 = vadd.f32 %v893_v50, %v447_v44 }
 0x144   :  { %1464 = vmatprep.subr.bf16.mxu0 %v1463_v22 }
 0x146   :  { %1261 = vmatmul.mubr.f32.gmra.mrb[2].mxu0 %v626_v62 }
 0x147   :  { %1263 = vmatprep.mubr.f32.mxu0 %v628_v8  ;;  %1466 = vmatpush3.bf16.msra.mxu0 %v1463_v22 }
 0x148   :  { %1468 = vmatprep.subr.bf16.mxu0 %v1467_v25 }
 0x14a   :  { %1264 = vmatmul.mubr.f32.gmra.mrb[4].mxu0 %v630_v15 }
 0x14b   :  { %1470 = vmatpush3.bf16.msra.mxu0 %v1467_v25  ;;  %1298 = vmatprep.mubr.f32.mxu0 %v1967_v23  ;;  %v923_v23 = vld [vmem:[%s2093_s3 + $0x168] sm:$0xff] }
 0x14c   :  { %1472 = vmatprep.subr.bf16.mxu0 %v1471_v28  ;;  %v1483_v33 = vpack.c.bf16 %v923_v23, %v922_v40 }
 0x14f   :  { %1474 = vmatpush3.bf16.msra.mxu0 %v1471_v28 }
 0x150   :  { %1476 = vmatprep.subr.bf16.mxu0 %v1475_v31 }
 0x153   :  { %1478 = vmatpush3.bf16.msra.mxu0 %v1475_v31 }
 0x154   :  { %1480 = vmatprep.subr.bf16.mxu0 %v1479_v39 }
 0x157   :  { %1482 = vmatpush3.bf16.msra.mxu0 %v1479_v39 }
 0x158   :  { %1484 = vmatprep.subr.bf16.mxu0 %v1483_v33 }
 0x15b   :  { %1486 = vmatpush3.bf16.msra.mxu0 %v1483_v33 }
 0x15c   :  { %1488 = vmatprep.subr.bf16.mxu0 %v1487_v43 }
 0x15f   :  { %1490 = vmatpush3.bf16.msra.mxu0 %v1487_v43 }
 0x162   :  { %1299 = vmatmul.mubr.f32.vlgmr.msra.gmra.mrb[0].mxu0 %v1980_v41 }
 0x163   :  { %1301 = vmatprep.mubr.f32.mxu0 %v1992_v36 }
 0x166   :  { %1302 = vmatmul.mubr.f32.gmra.mrb[2].mxu0 %v1998_v0  ;;  %v468_v0 = vadd.f32 %v893_v50, %v467_v49 }
 0x167   :  { %1304 = vmatprep.mubr.f32.mxu0 %v766_v9 }
 0x16a   :  { %1305 = vmatmul.mubr.f32.gmra.mrb[4].mxu0 %v768_v16 }
 0x235   :  { %v1300_v53 = vpop.f32.mrb[0].mxu0 }
 0x236   :  { %v1492_v41 = vadd.f32 %v1300_v53, %v453_v51  ;;  %v841_v36 = vpop.f32.mrb[1].mxu0 }
 0x237   :  { %v1494_v55 = vadd.f32 %v841_v36, %v448_v52 }
 0x238   :  { %v877_v57 = vmax.f32 %v1492_v41, 0.0 }
 0x239   :  { %v876_v58 = vmax.f32 %v1494_v55, 0.0  ;;  %v1303_v59 = vpop.f32.mrb[2].mxu0 }
 0x23a   :  { %883 = vst [vmem:[%s2097_s7 + $0x8] sm:$0xff] %v877_v57  ;;  %v1496_v60 = vadd.f32 %v1303_v59, %v463_v54  ;;  %v851_v62 = vpop.f32.mrb[3].mxu0 }
 0x23b   :  { %882 = vst [vmem:[%s2097_s7] sm:$0xff] %v876_v58  ;;  %v1498_v63 = vadd.f32 %v851_v62, %v458_v56 }
 0x23c   :  { %v879_v2 = vmax.f32 %v1496_v60, 0.0 }
 0x23d   :  { %v878_v46 = vmax.f32 %v1498_v63, 0.0  ;;  %v1306_v47 = vpop.f32.mrb[4].mxu0 }
 0x23e   :  { %885 = vst [vmem:[%s2097_s7 + $0x18] sm:$0xff] %v879_v2  ;;  %v1500_v3 = vadd.f32 %v1306_v47, %v473_v61  ;;  %v861_v4 = vpop.f32.mrb[5].mxu0 }
 0x23f   :  { %884 = vst [vmem:[%s2097_s7 + $0x10] sm:$0xff] %v878_v46  ;;  %v1502_v5 = vadd.f32 %v861_v4, %v468_v0 }
 0x240   :  { %v881_v6 = vmax.f32 %v1500_v3, 0.0 }
 0x241   :  { %v880_v7 = vmax.f32 %v1502_v5, 0.0 }
 0x242   :  { %887 = vst [vmem:[%s2097_s7 + $0x28] sm:$0xff] %v881_v6 }
 0x243   :  { %886 = vst [vmem:[%s2097_s7 + $0x20] sm:$0xff] %v880_v7 }

</bundles_post_ra>
